<compile_context>
chip_gen: v6e
topology: v6e:2x2x1
jax: 0.10.0
libtpu: 0.0.40
codegen_flags: <defaults>
</compile_context>

<pallas_src>
import jax
import jax.numpy as jnp
import numpy as np
from jax.experimental import pallas as pl
from jax.experimental.pallas import tpu as pltpu


def _ffn_ln_kernel(x_ref, w1_ref, w2_ref, gb_ref, o_ref):
    x = x_ref[...]                                                   # [TILE_M, D] f32

    # Position-wise feed forward: Linear -> ReLU -> Linear (no bias).
    # Matmuls run in the weight dtype (f32 or bf16), accumulate in f32 on the MXU.
    xm = x.astype(w1_ref.dtype)
    h = jnp.maximum(
        jnp.dot(xm, w1_ref[...], preferred_element_type=jnp.float32), 0.0)   # [TILE_M, F]
    ff = jnp.dot(h.astype(w2_ref.dtype), w2_ref[...],
                 preferred_element_type=jnp.float32)                          # [TILE_M, D]

    # Residual + LayerNorm over the feature axis (all f32).
    y = ff + x
    mean = jnp.mean(y, axis=-1, keepdims=True)
    var = jnp.mean((y - mean) ** 2, axis=-1, keepdims=True)
    yn = (y - mean) * jax.lax.rsqrt(var + 1e-5)        # rsqrt -> EUP slot, VALU stays free

    gamma = gb_ref[0:1, :]                             # [1, D]  (fused gamma/beta input)
    beta = gb_ref[1:2, :]                              # [1, D]
    o_ref[...] = (yn * gamma + beta).astype(o_ref.dtype)


def _choose_tile_m(n_rows, d, f, mm_itemsize, vmem_budget_bytes=24 << 20):
    """Largest row tile (multiple of 8, capped at 512) fitting a cross-generation budget."""
    weight_bytes = 2 * d * f * mm_itemsize + 2 * d * 4            # W1 + W2 + gamma/beta, single-buffered
    per_row = 2 * d * 4 + 2 * d * 4 + f * 4 + 2 * d * 4           # x(x2 bufs), out(x2 bufs), h, f32 temps
    avail = max(vmem_budget_bytes - weight_bytes, 8 * per_row)
    tile = min(int(avail // per_row), 512)
    tile = (tile // 128) * 128 if tile >= 128 else max(8, (tile // 8) * 8)
    n_ceil8 = -(-n_rows // 8) * 8
    return int(min(tile, max(8, n_ceil8)))


def poswise_ffn(x, W1, W2, gamma, beta, *, tile_m=None):
    """x: [B, S, D]; W1: [D, F]; W2: [F, D] (stored [in, out] = PyTorch weight.T);
    gamma/beta: [D].  W1/W2 may be f32 or bf16; residual + LayerNorm are always f32."""
    B, S, D = x.shape
    F = W1.shape[1]
    N = B * S
    mm_itemsize = jnp.dtype(W1.dtype).itemsize

    if tile_m is None:
        tile_m = _choose_tile_m(N, D, F, mm_itemsize)
    n_pad = pl.cdiv(N, tile_m) * tile_m

    x2 = x.reshape(N, D).astype(jnp.float32)
    if n_pad != N:
        x2 = jnp.pad(x2, ((0, n_pad - N), (0, 0)))
    gb = jnp.stack([gamma, beta], axis=0).astype(jnp.float32)       # fused [2, D]

    # Explicit VMEM budget: above v5e's 16 MiB scoped default when needed,
    # but always within v7x's 64 MiB physical VMEM.
    weight_bytes = 2 * D * F * mm_itemsize + 2 * D * 4
    per_row = 2 * D * 4 + 2 * D * 4 + F * 4 + 2 * D * 4
    vmem_limit = int(min(max(2 * (weight_bytes + per_row * tile_m) + (2 << 20),
                             16 << 20), 64 << 20))

    grid = (n_pad // tile_m,)

    def build(single_buffer_weights):
        if single_buffer_weights:
            wspec = lambda shape: pl.BlockSpec(shape, lambda i: (0, 0),
                                               pipeline_mode=pl.Buffered(1))
        else:
            wspec = lambda shape: pl.BlockSpec(shape, lambda i: (0, 0))
        return pl.pallas_call(
            _ffn_ln_kernel,
            out_shape=jax.ShapeDtypeStruct((n_pad, D), jnp.float32),
            grid_spec=pltpu.PrefetchScalarGridSpec(
                num_scalar_prefetch=0,
                grid=grid,
                in_specs=[
                    pl.BlockSpec((tile_m, D), lambda i: (i, 0)),    # x row tile (pipelined)
                    wspec((D, F)),                                  # W1 (resident)
                    wspec((F, D)),                                  # W2 (resident)
                    wspec((2, D)),                                  # gamma/beta (resident)
                ],
                out_specs=pl.BlockSpec((tile_m, D), lambda i: (i, 0)),
            ),
            compiler_params=pltpu.CompilerParams(
                dimension_semantics=("parallel",),       # shard row tiles across TCs on v7x
                vmem_limit_bytes=vmem_limit),
        )

    try:
        out = jax.block_until_ready(build(True)(x2, W1, W2, gb))
    except Exception:
        # Fallback if this JAX build rejects single-buffered (Buffered(1)) inputs.
        out = build(False)(x2, W1, W2, gb)

    if n_pad != N:
        out = out[:N]
    return out.reshape(B, S, D)


def poswise_ffn_ref(x, W1, W2, gamma, beta):
    """Pure-JAX reference matching the PyTorch module exactly (f32 throughout)."""
    h = jnp.maximum(jnp.dot(x, W1, precision=jax.lax.Precision.HIGHEST), 0.0)
    ff = jnp.dot(h, W2, precision=jax.lax.Precision.HIGHEST)
    y = ff + x
    mean = jnp.mean(y, axis=-1, keepdims=True)
    var = jnp.mean((y - mean) ** 2, axis=-1, keepdims=True)
    return (y - mean) / jnp.sqrt(var + 1e-5) * gamma + beta


if __name__ == "__main__":
    # MXU / lane aligned feature dims (D, F multiples of 128) per the perf review.
    B, S, D, F = 2, 24, 128, 256          # N = B*S = 48 rows

    key = jax.random.PRNGKey(0)
    kx, kw1, kw2, kg, kb = jax.random.split(key, 5)

    x = jax.random.normal(kx, (B, S, D), dtype=jnp.float32)
    # Weights stored [in, out] (= PyTorch Linear weight.T); no biases in the module.
    W1 = jax.random.normal(kw1, (D, F), dtype=jnp.float32) * 0.1
    W2 = jax.random.normal(kw2, (F, D), dtype=jnp.float32) * 0.1
    gamma = 1.0 + 0.01 * jax.random.normal(kg, (D,), dtype=jnp.float32)
    beta = 0.01 * jax.random.normal(kb, (D,), dtype=jnp.float32)

    ref = poswise_ffn_ref(x, W1, W2, gamma, beta)

    # 1) f32 weights, auto-sized tile (degenerates to one grid step at this size).
    out = jax.block_until_ready(poswise_ffn(x, W1, W2, gamma, beta))
    np.testing.assert_allclose(np.asarray(out), np.asarray(ref), rtol=1e-4, atol=1e-4)

    # 2) f32 weights, forced small tile -> multi-step row grid (pipelined, resident weights).
    out_tiled = jax.block_until_ready(poswise_ffn(x, W1, W2, gamma, beta, tile_m=16))
    np.testing.assert_allclose(np.asarray(out_tiled), np.asarray(ref), rtol=1e-4, atol=1e-4)

    # 3) bf16 weights (bf16 MXU matmuls, f32 accumulation + f32 LayerNorm),
    #    tile that does not divide N -> exercises the row-padding path.
    out_bf16 = jax.block_until_ready(
        poswise_ffn(x, W1.astype(jnp.bfloat16), W2.astype(jnp.bfloat16),
                    gamma, beta, tile_m=32))
    np.testing.assert_allclose(np.asarray(out_bf16), np.asarray(ref), rtol=5e-2, atol=5e-2)

    print("KERNEL_OK")
</pallas_src>

<mosaic_0001>
module attributes {stable_mosaic.version = 11 : i64} {
  func.func @_ffn_ln_kernel(%arg0: i32, %arg1: memref<48x128xf32, #tpu.memory_space<vmem>>, %arg2: memref<128x256xf32, #tpu.memory_space<vmem>>, %arg3: memref<256x128xf32, #tpu.memory_space<vmem>>, %arg4: memref<2x128xf32, #tpu.memory_space<vmem>>, %arg5: memref<48x128xf32, #tpu.memory_space<vmem>>) attributes {dimension_semantics = [#tpu.dimension_semantics<parallel>], iteration_bounds = array<i64: 1>, scalar_prefetch = 0 : i64, scratch_operands = 0 : i64, tpu.core_type = #tpu.core_type<tc>, window_params = [{transform_indices = @transform_0, window_bounds = array<i64: 48, 128>}, {pipeline_mode = #tpu.pipeline_mode<synchronous>, transform_indices = @transform_1, window_bounds = array<i64: 128, 256>}, {pipeline_mode = #tpu.pipeline_mode<synchronous>, transform_indices = @transform_2, window_bounds = array<i64: 256, 128>}, {pipeline_mode = #tpu.pipeline_mode<synchronous>, transform_indices = @transform_3, window_bounds = array<i64: 2, 128>}, {transform_indices = @transform_4, window_bounds = array<i64: 48, 128>}]} {
    %c0 = arith.constant 0 : index
    %c0_0 = arith.constant 0 : index
    %0 = vector.load %arg1[%c0, %c0_0] : memref<48x128xf32, #tpu.memory_space<vmem>>, vector<48x128xf32>
    %c0_1 = arith.constant 0 : index
    %c0_2 = arith.constant 0 : index
    %1 = vector.load %arg2[%c0_1, %c0_2] : memref<128x256xf32, #tpu.memory_space<vmem>>, vector<128x256xf32>
    %cst = arith.constant dense<0.000000e+00> : vector<48x256xf32>
    %2 = tpu.matmul %0, %1, %cst {dimension_numbers = #tpu.dot_dimension_numbers<[1], [0], [0], [1], [0, 0, 1, 1], [], []>} : vector<48x128xf32>, vector<128x256xf32>, vector<48x256xf32> -> vector<48x256xf32>
    %cst_3 = arith.constant 0.000000e+00 : f32
    %3 = vector.broadcast %cst_3 : f32 to vector<48x256xf32>
    %4 = arith.maximumf %2, %3 : vector<48x256xf32>
    %c0_4 = arith.constant 0 : index
    %c0_5 = arith.constant 0 : index
    %5 = vector.load %arg3[%c0_4, %c0_5] : memref<256x128xf32, #tpu.memory_space<vmem>>, vector<256x128xf32>
    %cst_6 = arith.constant dense<0.000000e+00> : vector<48x128xf32>
    %6 = tpu.matmul %4, %5, %cst_6 {dimension_numbers = #tpu.dot_dimension_numbers<[1], [0], [0], [1], [0, 0, 1, 1], [], []>} : vector<48x256xf32>, vector<256x128xf32>, vector<48x128xf32> -> vector<48x128xf32>
    %7 = arith.addf %6, %0 : vector<48x128xf32>
    %cst_7 = arith.constant dense<0.000000e+00> : vector<48xf32>
    %8 = vector.multi_reduction <add>, %7, %cst_7 [1] : vector<48x128xf32> to vector<48xf32>
    %9 = vector.shape_cast %8 : vector<48xf32> to vector<48x1xf32>
    %cst_8 = arith.constant 1.280000e+02 : f32
    %10 = vector.broadcast %cst_8 : f32 to vector<48x1xf32>
    %11 = arith.divf %9, %10 : vector<48x1xf32>
    %12 = vector.broadcast %11 : vector<48x1xf32> to vector<48x128xf32>
    %13 = arith.subf %7, %12 : vector<48x128xf32>
    %14 = arith.mulf %13, %13 : vector<48x128xf32>
    %cst_9 = arith.constant dense<0.000000e+00> : vector<48xf32>
    %15 = vector.multi_reduction <add>, %14, %cst_9 [1] : vector<48x128xf32> to vector<48xf32>
    %16 = vector.shape_cast %15 : vector<48xf32> to vector<48x1xf32>
    %cst_10 = arith.constant 1.280000e+02 : f32
    %17 = vector.broadcast %cst_10 : f32 to vector<48x1xf32>
    %18 = arith.divf %16, %17 : vector<48x1xf32>
    %19 = vector.broadcast %11 : vector<48x1xf32> to vector<48x128xf32>
    %20 = arith.subf %7, %19 : vector<48x128xf32>
    %cst_11 = arith.constant 9.99999974E-6 : f32
    %21 = vector.broadcast %cst_11 : f32 to vector<48x1xf32>
    %22 = arith.addf %18, %21 : vector<48x1xf32>
    %23 = math.rsqrt %22 : vector<48x1xf32>
    %24 = vector.broadcast %23 : vector<48x1xf32> to vector<48x128xf32>
    %25 = arith.mulf %20, %24 : vector<48x128xf32>
    %c0_12 = arith.constant 0 : index
    %c0_13 = arith.constant 0 : index
    %26 = vector.load %arg4[%c0_12, %c0_13] : memref<2x128xf32, #tpu.memory_space<vmem>>, vector<1x128xf32>
    %c1 = arith.constant 1 : index
    %c0_14 = arith.constant 0 : index
    %27 = vector.load %arg4[%c1, %c0_14] : memref<2x128xf32, #tpu.memory_space<vmem>>, vector<1x128xf32>
    %28 = vector.broadcast %26 : vector<1x128xf32> to vector<48x128xf32>
    %29 = arith.mulf %25, %28 : vector<48x128xf32>
    %30 = vector.broadcast %27 : vector<1x128xf32> to vector<48x128xf32>
    %31 = arith.addf %29, %30 : vector<48x128xf32>
    %c0_15 = arith.constant 0 : index
    %c0_16 = arith.constant 0 : index
    %32 = vector.load %arg5[%c0_15, %c0_16] : memref<48x128xf32, #tpu.memory_space<vmem>>, vector<48x128xf32>
    tpu.vector_store %arg5[%c0_15, %c0_16], %31 {strides = array<i32>} : memref<48x128xf32, #tpu.memory_space<vmem>>, vector<48x128xf32>,
    return
  }
  func.func @transform_0(%arg0: i32) -> (i32, i32) {
    %c0_i32 = arith.constant 0 : i32
    %c0_i32_0 = arith.constant 0 : i32
    return %arg0, %c0_i32 : i32, i32
  }
  func.func @transform_1(%arg0: i32) -> (i32, i32) {
    %c0_i32 = arith.constant 0 : i32
    %c0_i32_0 = arith.constant 0 : i32
    %c0_i32_1 = arith.constant 0 : i32
    return %c0_i32, %c0_i32_0 : i32, i32
  }
  func.func @transform_2(%arg0: i32) -> (i32, i32) {
    %c0_i32 = arith.constant 0 : i32
    %c0_i32_0 = arith.constant 0 : i32
    %c0_i32_1 = arith.constant 0 : i32
    return %c0_i32, %c0_i32_0 : i32, i32
  }
  func.func @transform_3(%arg0: i32) -> (i32, i32) {
    %c0_i32 = arith.constant 0 : i32
    %c0_i32_0 = arith.constant 0 : i32
    %c0_i32_1 = arith.constant 0 : i32
    return %c0_i32, %c0_i32_0 : i32, i32
  }
  func.func @transform_4(%arg0: i32) -> (i32, i32) {
    %c0_i32 = arith.constant 0 : i32
    %c0_i32_0 = arith.constant 0 : i32
    return %arg0, %c0_i32 : i32, i32
  }
}

module attributes {stable_mosaic.version = 11 : i64} {
  func.func @_ffn_ln_kernel(%arg0: i32, %arg1: memref<48x128xf32, #tpu.memory_space<vmem>>, %arg2: memref<128x256xf32, #tpu.memory_space<vmem>>, %arg3: memref<256x128xf32, #tpu.memory_space<vmem>>, %arg4: memref<2x128xf32, #tpu.memory_space<vmem>>, %arg5: memref<48x128xf32, #tpu.memory_space<vmem>>) attributes {dimension_semantics = [#tpu.dimension_semantics<parallel>], iteration_bounds = array<i64: 1>, scalar_prefetch = 0 : i64, scratch_operands = 0 : i64, tpu.core_type = #tpu.core_type<tc>, window_params = [{transform_indices = @transform_0, window_bounds = array<i64: 48, 128>}, {pipeline_mode = #tpu.pipeline_mode<synchronous>, transform_indices = @transform_1, window_bounds = array<i64: 128, 256>}, {pipeline_mode = #tpu.pipeline_mode<synchronous>, transform_indices = @transform_2, window_bounds = array<i64: 256, 128>}, {pipeline_mode = #tpu.pipeline_mode<synchronous>, transform_indices = @transform_3, window_bounds = array<i64: 2, 128>}, {transform_indices = @transform_4, window_bounds = array<i64: 48, 128>}]} {
    %c0 = arith.constant 0 : index
    %c0_0 = arith.constant 0 : index
    %0 = vector.load %arg1[%c0, %c0_0] : memref<48x128xf32, #tpu.memory_space<vmem>>, vector<48x128xf32>
    %c0_1 = arith.constant 0 : index
    %c0_2 = arith.constant 0 : index
    %1 = vector.load %arg2[%c0_1, %c0_2] : memref<128x256xf32, #tpu.memory_space<vmem>>, vector<128x256xf32>
    %cst = arith.constant dense<0.000000e+00> : vector<48x256xf32>
    %2 = tpu.matmul %0, %1, %cst {dimension_numbers = #tpu.dot_dimension_numbers<[1], [0], [0], [1], [0, 0, 1, 1], [], []>} : vector<48x128xf32>, vector<128x256xf32>, vector<48x256xf32> -> vector<48x256xf32>
    %cst_3 = arith.constant 0.000000e+00 : f32
    %3 = vector.broadcast %cst_3 : f32 to vector<48x256xf32>
    %4 = arith.maximumf %2, %3 : vector<48x256xf32>
    %c0_4 = arith.constant 0 : index
    %c0_5 = arith.constant 0 : index
    %5 = vector.load %arg3[%c0_4, %c0_5] : memref<256x128xf32, #tpu.memory_space<vmem>>, vector<256x128xf32>
    %cst_6 = arith.constant dense<0.000000e+00> : vector<48x128xf32>
    %6 = tpu.matmul %4, %5, %cst_6 {dimension_numbers = #tpu.dot_dimension_numbers<[1], [0], [0], [1], [0, 0, 1, 1], [], []>} : vector<48x256xf32>, vector<256x128xf32>, vector<48x128xf32> -> vector<48x128xf32>
    %7 = arith.addf %6, %0 : vector<48x128xf32>
    %cst_7 = arith.constant dense<0.000000e+00> : vector<48xf32>
    %8 = vector.multi_reduction <add>, %7, %cst_7 [1] : vector<48x128xf32> to vector<48xf32>
    %9 = vector.shape_cast %8 : vector<48xf32> to vector<48x1xf32>
    %cst_8 = arith.constant 1.280000e+02 : f32
    %10 = vector.broadcast %cst_8 : f32 to vector<48x1xf32>
    %11 = arith.divf %9, %10 : vector<48x1xf32>
    %12 = vector.broadcast %11 : vector<48x1xf32> to vector<48x128xf32>
    %13 = arith.subf %7, %12 : vector<48x128xf32>
    %14 = arith.mulf %13, %13 : vector<48x128xf32>
    %cst_9 = arith.constant dense<0.000000e+00> : vector<48xf32>
    %15 = vector.multi_reduction <add>, %14, %cst_9 [1] : vector<48x128xf32> to vector<48xf32>
    %16 = vector.shape_cast %15 : vector<48xf32> to vector<48x1xf32>
    %cst_10 = arith.constant 1.280000e+02 : f32
    %17 = vector.broadcast %cst_10 : f32 to vector<48x1xf32>
    %18 = arith.divf %16, %17 : vector<48x1xf32>
    %19 = vector.broadcast %11 : vector<48x1xf32> to vector<48x128xf32>
    %20 = arith.subf %7, %19 : vector<48x128xf32>
    %cst_11 = arith.constant 9.99999974E-6 : f32
    %21 = vector.broadcast %cst_11 : f32 to vector<48x1xf32>
    %22 = arith.addf %18, %21 : vector<48x1xf32>
    %23 = math.rsqrt %22 : vector<48x1xf32>
    %24 = vector.broadcast %23 : vector<48x1xf32> to vector<48x128xf32>
    %25 = arith.mulf %20, %24 : vector<48x128xf32>
    %c0_12 = arith.constant 0 : index
    %c0_13 = arith.constant 0 : index
    %26 = vector.load %arg4[%c0_12, %c0_13] : memref<2x128xf32, #tpu.memory_space<vmem>>, vector<1x128xf32>
    %c1 = arith.constant 1 : index
    %c0_14 = arith.constant 0 : index
    %27 = vector.load %arg4[%c1, %c0_14] : memref<2x128xf32, #tpu.memory_space<vmem>>, vector<1x128xf32>
    %28 = vector.broadcast %26 : vector<1x128xf32> to vector<48x128xf32>
    %29 = arith.mulf %25, %28 : vector<48x128xf32>
    %30 = vector.broadcast %27 : vector<1x128xf32> to vector<48x128xf32>
    %31 = arith.addf %29, %30 : vector<48x128xf32>
    %c0_15 = arith.constant 0 : index
    %c0_16 = arith.constant 0 : index
    %32 = vector.load %arg5[%c0_15, %c0_16] : memref<48x128xf32, #tpu.memory_space<vmem>>, vector<48x128xf32>
    tpu.vector_store %arg5[%c0_15, %c0_16], %31 {strides = array<i32>} : memref<48x128xf32, #tpu.memory_space<vmem>>, vector<48x128xf32>,
    return
  }
  func.func @transform_0(%arg0: i32) -> (i32, i32) {
    %c0_i32 = arith.constant 0 : i32
    %c0_i32_0 = arith.constant 0 : i32
    return %arg0, %c0_i32 : i32, i32
  }
  func.func @transform_1(%arg0: i32) -> (i32, i32) {
    %c0_i32 = arith.constant 0 : i32
    %c0_i32_0 = arith.constant 0 : i32
    %c0_i32_1 = arith.constant 0 : i32
    return %c0_i32, %c0_i32_0 : i32, i32
  }
  func.func @transform_2(%arg0: i32) -> (i32, i32) {
    %c0_i32 = arith.constant 0 : i32
    %c0_i32_0 = arith.constant 0 : i32
    %c0_i32_1 = arith.constant 0 : i32
    return %c0_i32, %c0_i32_0 : i32, i32
  }
  func.func @transform_3(%arg0: i32) -> (i32, i32) {
    %c0_i32 = arith.constant 0 : i32
    %c0_i32_0 = arith.constant 0 : i32
    %c0_i32_1 = arith.constant 0 : i32
    return %c0_i32, %c0_i32_0 : i32, i32
  }
  func.func @transform_4(%arg0: i32) -> (i32, i32) {
    %c0_i32 = arith.constant 0 : i32
    %c0_i32_0 = arith.constant 0 : i32
    return %arg0, %c0_i32 : i32, i32
  }
}

</mosaic_0001>

<bundles_post_ra>
// kernel: tpu_custom_call.1
= control target key start
LH: loop header
LB: loop body
LE: loop exit
PB: predicated region body
PF: predicated region fallthrough
CT: control target
= control target key end

     0   :  { %9 = vsyncpa [#allocation3], 0  ;;  %s700_s0 = inlined_call_operand.hbm [shape: f32[48,128], index: 0, kind: input, shape index: {}]   ;;  %s701_s1 = inlined_call_operand.hbm [shape: f32[128,256], index: 1, kind: input, shape index: {}]   ;;  %s702_s2 = inlined_call_operand.hbm [shape: f32[256,128], index: 2, kind: input, shape index: {}]   ;;  %s703_s3 = inlined_call_operand.vmem [shape: f32[2,128], index: 3, kind: input, shape index: {}]   ;;  %s704_s4 = inlined_call_operand.hbm [shape: f32[48,128], index: 4, kind: output, shape index: {}]  }
   0x1   :  { %10 = vsyncpa [#allocation6], 0 }
   0x2   :  { %11 = vsyncpa [#allocation4], 0  ;;  %s609_s15 = smov [#allocation5]  }
   0x3   :  { %s29_s16 = sshll.u32 %s609_s15, 4  ;;  %s30_s16 = int_to_ptr.vmem [resolvable:$true] %s29_s16 }
   0x4   :  { %s531_s17 = scalar_lea.vmem %s30_s16, 4096  ;;  %p536_p1 = scmp.lt.s32.totalorder %s30_s16, %s30_s16 }
   0x5   :  { %p532_p0 = scmp.ne.s32.totalorder %s30_s16, %s531_s17  ;;  %p537_p2 = scmp.lt.s32.totalorder %s531_s17, %s531_s17 }
   0x7   :  { %p538_p3 = por %p537_p2, %p536_p1 }
   0x9   :  { %p539_p4 = pnand %p538_p3, %p532_p0 }
   0xb   :  { %542 = shalt.err (!%p539_p4)
}
   0xc   :  { %s610_s18 = smov 256   ;;  %s611_s19 = smov 16  }
   0xd   :  { %35 = dma.hbm_to_vmem [thread:$0]  %s701_s1, 4096, %s30_s16, [#allocation6], %s610_s18, %s610_s18, %s611_s19  }
   0xe   :  { %s612_s22 = smov [#allocation2]  }
   0xf   :  { %s17_s23 = sshll.u32 %s612_s22, 4  ;;  %s18_s23 = int_to_ptr.vmem [resolvable:$true] %s17_s23 }
  0x10   :  { %s551_s24 = scalar_lea.vmem %s18_s23, 768  ;;  %p556_p6 = scmp.lt.s32.totalorder %s18_s23, %s18_s23 }
  0x11   :  { %p552_p5 = scmp.ne.s32.totalorder %s18_s23, %s551_s24  ;;  %p557_p7 = scmp.lt.s32.totalorder %s551_s24, %s551_s24 }
  0x13   :  { %p558_p8 = por %p557_p7, %p556_p6 }
  0x15   :  { %p559_p9 = pnand %p558_p8, %p552_p5 }
  0x17   :  { %562 = shalt.err (!%p559_p9)
}
  0x18   :  { %s613_s25 = smov 128   ;;  %s614_s26 = smov 8  }
  0x19   :  { %23 = dma.hbm_to_vmem [thread:$0]  %s700_s0, 768, %s18_s23, [#allocation3], %s613_s25, %s613_s25, %s614_s26  }
  0x1a   :  { %s615_s1 = smov [#allocation7]  }
  0x1b   :  { %s41_s29 = sshll.u32 %s615_s1, 4  ;;  %s42_s29 = int_to_ptr.vmem [resolvable:$true] %s41_s29 }
  0x1c   :  { %s571_s30 = scalar_lea.vmem %s42_s29, 4096  ;;  %p576_p11 = scmp.lt.s32.totalorder %s42_s29, %s42_s29 }
  0x1d   :  { %p572_p10 = scmp.ne.s32.totalorder %s42_s29, %s571_s30  ;;  %p577_p12 = scmp.lt.s32.totalorder %s571_s30, %s571_s30 }
  0x1f   :  { %p578_p13 = por %p577_p12, %p576_p11 }
  0x21   :  { %p579_p0 = pnand %p578_p13, %p572_p10 }
  0x23   :  { %582 = shalt.err (!%p579_p0)
}
  0x24   :  { %47 = dma.hbm_to_vmem [thread:$0]  %s702_s2, 4096, %s42_s29, [#allocation6], %s613_s25, %s613_s25, %s614_s26  }
  0x25   :  { %603 = dma.done.wait [#allocation3], 768  }
  0x26   :  { %604 = vsyncadd [#allocation3], 4294966528 }
  0x27   :  { %605 = dma.done.wait [#allocation6], 8192  }
  0x28   :  { %606 = vsyncadd [#allocation6], 4294959104  ;;  %v616_v0 = vmov 0.0   ;;  %v96_v1 = vld [vmem:[#allocation5 + $0xf8] sm:$0xff]  ;;  %v95_v2 = vld [vmem:[#allocation5 + $0xf0] sm:$0xff] }
  0x29   :  { %161 = vmatprep.mubr.f32.mxu0 %v616_v0  ;;  %v94_v3 = vld [vmem:[#allocation5 + $0xe8] sm:$0xff]  ;;  %97 = vmatprep.subr.mxu0 %v96_v1  ;;  %v93_v4 = vld [vmem:[#allocation5 + $0xe0] sm:$0xff]  ;;  %v92_v5 = vld [vmem:[#allocation5 + $0xd8] sm:$0xff] }
  0x2a   :  { %98 = vmatpush1.msra.mxu0 %v95_v2  ;;  %v91_v6 = vld [vmem:[#allocation5 + $0xd0] sm:$0xff]  ;;  %v90_v7 = vld [vmem:[#allocation5 + $0xc8] sm:$0xff]  ;;  %v89_v8 = vld [vmem:[#allocation5 + $0xc0] sm:$0xff] }
  0x2b   :  { %99 = vmatprep.subr.mxu0 %v94_v3  ;;  %v88_v9 = vld [vmem:[#allocation5 + $0xb8] sm:$0xff]  ;;  %v87_v10 = vld [vmem:[#allocation5 + $0xb0] sm:$0xff]  ;;  %v86_v11 = vld [vmem:[#allocation5 + $0xa8] sm:$0xff] }
  0x2c   :  { %100 = vmatpush1.msra.mxu0 %v93_v4  ;;  %v85_v12 = vld [vmem:[#allocation5 + $0xa0] sm:$0xff]  ;;  %v84_v13 = vld [vmem:[#allocation5 + $0x98] sm:$0xff]  ;;  %v83_v14 = vld [vmem:[#allocation5 + $0x90] sm:$0xff] }
  0x2d   :  { %101 = vmatprep.subr.mxu0 %v92_v5  ;;  %v82_v15 = vld [vmem:[#allocation5 + $0x88] sm:$0xff]  ;;  %v81_v16 = vld [vmem:[#allocation5 + $0x80] sm:$0xff]  ;;  %v241_v17 = vld [vmem:[#allocation7 + $0xf8] sm:$0xff] }
  0x2e   :  { %102 = vmatpush1.msra.mxu0 %v91_v6  ;;  %452 = vmatprep.subr.mxu1 %v241_v17  ;;  %v225_v18 = vld [vmem:[#allocation7 + $0x78] sm:$0xff]  ;;  %v240_v19 = vld [vmem:[#allocation7 + $0xf0] sm:$0xff]  ;;  %v239_v22 = vld [vmem:[#allocation7 + $0xe8] sm:$0xff] }
  0x2f   :  { %103 = vmatprep.subr.mxu0 %v90_v7  ;;  %v224_v20 = vld [vmem:[#allocation7 + $0x70] sm:$0xff]  ;;  %v80_v21 = vld [vmem:[#allocation5 + $0x78] sm:$0xff]  ;;  %453 = vmatpush3.msra.mxu1 %v225_v18  ;;  %v223_v24 = vld [vmem:[#allocation7 + $0x68] sm:$0xff] }
  0x30   :  { %104 = vmatpush1.msra.mxu0 %v89_v8  ;;  %v79_v23 = vld [vmem:[#allocation5 + $0x70] sm:$0xff]  ;;  %454 = vmatprep.subr.mxu1 %v240_v19  ;;  %v78_v25 = vld [vmem:[#allocation5 + $0x68] sm:$0xff]  ;;  %v238_v26 = vld [vmem:[#allocation7 + $0xe0] sm:$0xff] }
  0x31   :  { %105 = vmatprep.subr.mxu0 %v88_v9  ;;  %455 = vmatpush3.msra.mxu1 %v224_v20  ;;  %v77_v27 = vld [vmem:[#allocation5 + $0x60] sm:$0xff]  ;;  %v76_v29 = vld [vmem:[#allocation5 + $0x58] sm:$0xff]  ;;  %v75_v31 = vld [vmem:[#allocation5 + $0x50] sm:$0xff] }
  0x32   :  { %106 = vmatpush1.msra.mxu0 %v87_v10  ;;  %456 = vmatprep.subr.mxu1 %v239_v22  ;;  %v222_v28 = vld [vmem:[#allocation7 + $0x60] sm:$0xff]  ;;  %v237_v30 = vld [vmem:[#allocation7 + $0xd8] sm:$0xff]  ;;  %v74_v33 = vld [vmem:[#allocation5 + $0x48] sm:$0xff] }
  0x33   :  { %107 = vmatprep.subr.mxu0 %v86_v11  ;;  %457 = vmatpush3.msra.mxu1 %v223_v24  ;;  %v221_v32 = vld [vmem:[#allocation7 + $0x58] sm:$0xff]  ;;  %v236_v34 = vld [vmem:[#allocation7 + $0xd0] sm:$0xff]  ;;  %v73_v35 = vld [vmem:[#allocation5 + $0x40] sm:$0xff] }
  0x34   :  { %108 = vmatpush1.msra.mxu0 %v85_v12  ;;  %458 = vmatprep.subr.mxu1 %v238_v26  ;;  %v220_v36 = vld [vmem:[#allocation7 + $0x50] sm:$0xff]  ;;  %v72_v37 = vld [vmem:[#allocation5 + $0x38] sm:$0xff]  ;;  %v235_v38 = vld [vmem:[#allocation7 + $0xc8] sm:$0xff] }
  0x35   :  { %109 = vmatprep.subr.mxu0 %v84_v13  ;;  %459 = vmatpush3.msra.mxu1 %v222_v28  ;;  %v71_v39 = vld [vmem:[#allocation5 + $0x30] sm:$0xff]  ;;  %v219_v40 = vld [vmem:[#allocation7 + $0x48] sm:$0xff]  ;;  %v234_v42 = vld [vmem:[#allocation7 + $0xc0] sm:$0xff] }
  0x36   :  { %110 = vmatpush1.msra.mxu0 %v83_v14  ;;  %460 = vmatprep.subr.mxu1 %v237_v30  ;;  %v70_v41 = vld [vmem:[#allocation5 + $0x28] sm:$0xff]  ;;  %v69_v43 = vld [vmem:[#allocation5 + $0x20] sm:$0xff]  ;;  %v68_v45 = vld [vmem:[#allocation5 + $0x18] sm:$0xff] }
  0x37   :  { %111 = vmatprep.subr.mxu0 %v82_v15  ;;  %461 = vmatpush3.msra.mxu1 %v221_v32  ;;  %v218_v44 = vld [vmem:[#allocation7 + $0x40] sm:$0xff]  ;;  %v233_v46 = vld [vmem:[#allocation7 + $0xb8] sm:$0xff]  ;;  %v67_v47 = vld [vmem:[#allocation5 + $0x10] sm:$0xff] }
  0x38   :  { %112 = vmatpush1.msra.mxu0 %v81_v16  ;;  %462 = vmatprep.subr.mxu1 %v236_v34  ;;  %v217_v48 = vld [vmem:[#allocation7 + $0x38] sm:$0xff]  ;;  %v66_v49 = vld [vmem:[#allocation5 + $0x8] sm:$0xff]  ;;  %v232_v50 = vld [vmem:[#allocation7 + $0xb0] sm:$0xff] }
  0x39   :  { %113 = vmatprep.subr.mxu0 %v80_v21  ;;  %463 = vmatpush3.msra.mxu1 %v220_v36  ;;  %v65_v51 = vld [vmem:[#allocation5] sm:$0xff]  ;;  %v216_v52 = vld [vmem:[#allocation7 + $0x30] sm:$0xff]  ;;  %v231_v54 = vld [vmem:[#allocation7 + $0xa8] sm:$0xff] }
  0x3a   :  { %114 = vmatpush1.msra.mxu0 %v79_v23  ;;  %464 = vmatprep.subr.mxu1 %v235_v38  ;;  %v659_v53 = vld [vmem:[#allocation2] sm:$0xff]  ;;  %v215_v55 = vld [vmem:[#allocation7 + $0x28] sm:$0xff]  ;;  %v230_v56 = vld [vmem:[#allocation7 + $0xa0] sm:$0xff] }
  0x3b   :  { %115 = vmatprep.subr.mxu0 %v78_v25  ;;  %465 = vmatpush3.msra.mxu1 %v219_v40  ;;  %v214_v57 = vld [vmem:[#allocation7 + $0x20] sm:$0xff]  ;;  %v663_v58 = vld [vmem:[#allocation2 + $0x8] sm:$0xff]  ;;  %v671_v62 = vld [vmem:[#allocation2 + $0x18] sm:$0xff] }
  0x3c   :  { %116 = vmatpush1.msra.mxu0 %v77_v27  ;;  %466 = vmatprep.subr.mxu1 %v234_v42  ;;  %v229_v59 = vld [vmem:[#allocation7 + $0x98] sm:$0xff]  ;;  %v667_v61 = vld [vmem:[#allocation2 + $0x10] sm:$0xff]  ;;  %v675_v63 = vld [vmem:[#allocation2 + $0x20] sm:$0xff] }
  0x3d   :  { %117 = vmatprep.subr.mxu0 %v76_v29  ;;  %467 = vmatpush3.msra.mxu1 %v218_v44  ;;  %v213_v60 = vld [vmem:[#allocation7 + $0x18] sm:$0xff]  ;;  %v228_v2 = vld [vmem:[#allocation7 + $0x90] sm:$0xff]  ;;  %v227_v4 = vld [vmem:[#allocation7 + $0x88] sm:$0xff] }
  0x3e   :  { %118 = vmatpush1.msra.mxu0 %v75_v31  ;;  %468 = vmatprep.subr.mxu1 %v233_v46  ;;  %v679_v1 = vld [vmem:[#allocation2 + $0x28] sm:$0xff]  ;;  %v212_v3 = vld [vmem:[#allocation7 + $0x10] sm:$0xff]  ;;  %v211_v5 = vld [vmem:[#allocation7 + $0x8] sm:$0xff] }
  0x3f   :  { %119 = vmatprep.subr.mxu0 %v74_v33  ;;  %469 = vmatpush3.msra.mxu1 %v217_v48  ;;  %v226_v6 = vld [vmem:[#allocation7 + $0x80] sm:$0xff] }
  0x40   :  { %120 = vmatpush1.msra.mxu0 %v73_v35  ;;  %470 = vmatprep.subr.mxu1 %v232_v50  ;;  %v210_v7 = vld [vmem:[#allocation7] sm:$0xff] }
  0x41   :  { %121 = vmatprep.subr.mxu0 %v72_v37  ;;  %471 = vmatpush3.msra.mxu1 %v216_v52 }
  0x42   :  { %122 = vmatpush1.msra.mxu0 %v71_v39  ;;  %472 = vmatprep.subr.mxu1 %v231_v54 }
  0x43   :  { %123 = vmatprep.subr.mxu0 %v70_v41  ;;  %473 = vmatpush3.msra.mxu1 %v215_v55 }
  0x44   :  { %124 = vmatpush1.msra.mxu0 %v69_v43  ;;  %474 = vmatprep.subr.mxu1 %v230_v56 }
  0x45   :  { %125 = vmatprep.subr.mxu0 %v68_v45  ;;  %475 = vmatpush3.msra.mxu1 %v214_v57 }
  0x46   :  { %126 = vmatpush1.msra.mxu0 %v67_v47  ;;  %476 = vmatprep.subr.mxu1 %v229_v59 }
  0x47   :  { %127 = vmatprep.subr.mxu0 %v66_v49  ;;  %477 = vmatpush3.msra.mxu1 %v213_v60 }
  0x48   :  { %128 = vmatpush1.msra.mxu0 %v65_v51  ;;  %478 = vmatprep.subr.mxu1 %v228_v2 }
  0x49   :  { %162 = vmatmul.mubr.f32.vlgmr.msra.gmra.mxu0 %v659_v53  ;;  %479 = vmatpush3.msra.mxu1 %v212_v3 }
  0x4a   :  { %167 = vmatprep.mubr.f32.mxu0 %v616_v0  ;;  %480 = vmatprep.subr.mxu1 %v227_v4 }
  0x4b   :  { %481 = vmatpush3.msra.mxu1 %v211_v5 }
  0x4c   :  { %482 = vmatprep.subr.mxu1 %v226_v6 }
  0x4d   :  { %168 = vmatmul.mubr.f32.gmra.mxu0 %v663_v58  ;;  %483 = vmatpush3.msra.mxu1 %v210_v7 }
  0x4e   :  { %173 = vmatprep.mubr.f32.mxu0 %v616_v0 }
  0x51   :  { %174 = vmatmul.mubr.f32.gmra.mxu0 %v667_v61 }
  0x52   :  { %179 = vmatprep.mubr.f32.mxu0 %v616_v0 }
  0x55   :  { %180 = vmatmul.mubr.f32.gmra.mxu0 %v671_v62 }
  0x56   :  { %185 = vmatprep.mubr.f32.mxu0 %v616_v0 }
  0x59   :  { %186 = vmatmul.mubr.f32.gmra.mxu0 %v675_v63 }
  0x5a   :  { %191 = vmatprep.mubr.f32.mxu0 %v616_v0 }
  0x5d   :  { %192 = vmatmul.mubr.f32.gmra.mxu0 %v679_v1 }
 0x109   :  { %v163_v8 = vpop.f32.mrf.mxu0 }
 0x10a   :  { %v198_v0 = vmax.f32 %v163_v8, 0.0 }
 0x10b   :  { %v165_v9 = vpop.f32.mrf.mxu0 }
 0x10c   :  { %v199_v10 = vmax.f32 %v165_v9, 0.0 }
 0x10d   :  { %v169_v11 = vpop.f32.mrf.mxu0 }
 0x10e   :  { %306 = vmatprep.mubr.f32.mxu1 %v199_v10  ;;  %v200_v14 = vmax.f32 %v169_v11, 0.0 }
 0x10f   :  { %v171_v12 = vpop.f32.mrf.mxu0  ;;  %307 = vmatmul.mubr.f32.vlgmr.msra.gmra.mxu1 %v198_v0 }
 0x110   :  { %v201_v13 = vmax.f32 %v171_v12, 0.0 }
 0x111   :  { %v175_v15 = vpop.f32.mrf.mxu0 }
 0x112   :  { %311 = vmatprep.mubr.f32.mxu1 %v201_v13  ;;  %v202_v18 = vmax.f32 %v175_v15, 0.0 }
 0x113   :  { %v177_v16 = vpop.f32.mrf.mxu0  ;;  %312 = vmatmul.mubr.f32.gmra.mxu1 %v200_v14 }
 0x114   :  { %v203_v17 = vmax.f32 %v177_v16, 0.0 }
 0x115   :  { %v181_v19 = vpop.f32.mrf.mxu0 }
 0x116   :  { %316 = vmatprep.mubr.f32.mxu1 %v203_v17  ;;  %v204_v22 = vmax.f32 %v181_v19, 0.0 }
 0x117   :  { %v183_v20 = vpop.f32.mrf.mxu0  ;;  %317 = vmatmul.mubr.f32.gmra.mxu1 %v202_v18 }
 0x118   :  { %v205_v21 = vmax.f32 %v183_v20, 0.0 }
 0x119   :  { %v187_v23 = vpop.f32.mrf.mxu0 }
 0x11a   :  { %321 = vmatprep.mubr.f32.mxu1 %v205_v21  ;;  %v206_v26 = vmax.f32 %v187_v23, 0.0 }
 0x11b   :  { %v189_v24 = vpop.f32.mrf.mxu0  ;;  %322 = vmatmul.mubr.f32.gmra.mxu1 %v204_v22 }
 0x11c   :  { %v207_v25 = vmax.f32 %v189_v24, 0.0 }
 0x11d   :  { %v193_v27 = vpop.f32.mrf.mxu0 }
 0x11e   :  { %326 = vmatprep.mubr.f32.mxu1 %v207_v25  ;;  %v208_v30 = vmax.f32 %v193_v27, 0.0 }
 0x11f   :  { %v195_v28 = vpop.f32.mrf.mxu0  ;;  %327 = vmatmul.mubr.f32.gmra.mxu1 %v206_v26 }
 0x120   :  { %v209_v29 = vmax.f32 %v195_v28, 0.0 }
 0x122   :  { %331 = vmatprep.mubr.f32.mxu1 %v209_v29 }
 0x123   :  { %332 = vmatmul.mubr.f32.gmra.mxu1 %v208_v30  ;;  %v450_v30 = vld [vmem:[%s703_s3] ss:$0 sm:$0xff] }
 0x1cf   :  { %v484_v31 = vpop.f32.mrf.mxu1 }
 0x1d1   :  { %v485_v32 = vpop.f32.mrf.mxu1 }
 0x1d2   :  { %v486_v33 = vadd.f32 %v485_v32, %v484_v31 }
 0x1d3   :  { %v487_v34 = vpop.f32.mrf.mxu1 }
 0x1d4   :  { %v309_v35 = vadd.f32 %v486_v33, %v659_v53 }
 0x1d5   :  { %v488_v36 = vpop.f32.mrf.mxu1 }
 0x1d6   :  { %v489_v37 = vadd.f32 %v488_v36, %v487_v34  ;;  %337 = vadd.xlane.f32.xlu0 %v309_v35  ;;  %v451_v34 = vld [vmem:[%s703_s3 + $0x1] ss:$0 sm:$0xff]  ;;  %s617_s3 = smov [#allocation8]  }
 0x1d7   :  { %v490_v38 = vpop.f32.mrf.mxu1  ;;  %s437_s9 = sshll.u32 %s617_s3, 4  ;;  %s438_s9 = int_to_ptr.vmem [resolvable:$true] %s437_s9 }
 0x1d8   :  { %v314_v39 = vadd.f32 %v489_v37, %v663_v58  ;;  %s583_s10 = scalar_lea.vmem %s438_s9, 768  ;;  %p588_p2 = scmp.lt.s32.totalorder %s438_s9, %s438_s9 }
 0x1d9   :  { %v491_v40 = vpop.f32.mrf.mxu1  ;;  %p584_p1 = scmp.ne.s32.totalorder %s438_s9, %s583_s10  ;;  %p589_p3 = scmp.lt.s32.totalorder %s583_s10, %s583_s10 }
 0x1da   :  { %v492_v41 = vadd.f32 %v491_v40, %v490_v38  ;;  %339 = vadd.xlane.f32.xlu0 %v314_v39 }
 0x1db   :  { %v493_v42 = vpop.f32.mrf.mxu1  ;;  %p590_p4 = por %p589_p3, %p588_p2 }
 0x1dc   :  { %v319_v43 = vadd.f32 %v492_v41, %v667_v61 }
 0x1dd   :  { %v494_v44 = vpop.f32.mrf.mxu1  ;;  %p591_p5 = pnand %p590_p4, %p584_p1 }
 0x1de   :  { %v495_v45 = vadd.f32 %v494_v44, %v493_v42  ;;  %341 = vadd.xlane.f32.xlu1 %v319_v43 }
 0x1df   :  { %v496_v46 = vpop.f32.mrf.mxu1 }
 0x1e0   :  { %v324_v47 = vadd.f32 %v495_v45, %v671_v62 }
 0x1e1   :  { %v497_v48 = vpop.f32.mrf.mxu1 }
 0x1e2   :  { %v498_v49 = vadd.f32 %v497_v48, %v496_v46  ;;  %343 = vadd.xlane.f32.xlu1 %v324_v47 }
 0x1e3   :  { %v499_v50 = vpop.f32.mrf.mxu1 }
 0x1e4   :  { %v329_v51 = vadd.f32 %v498_v49, %v675_v63 }
 0x1e5   :  { %v500_v52 = vpop.f32.mrf.mxu1 }
 0x1e6   :  { %v501_v53 = vadd.f32 %v500_v52, %v499_v50  ;;  %345 = vadd.xlane.f32.xlu0 %v329_v51 }
 0x1e8   :  { %v334_v54 = vadd.f32 %v501_v53, %v679_v1 }
 0x1ea   :  { %347 = vadd.xlane.f32.xlu1 %v334_v54 }
 0x25f   :  { %v338_v55 = vpop.xlane.xlu0 %337 }
 0x260   :  { %v350_v56 = vmul.f32 0.0078125, %v338_v55 }
 0x262   :  { %v356_v57 = vsub.f32 %v309_v35, %v350_v56 }
 0x263   :  { %v340_v58 = vpop.xlane.xlu0 %339 }
 0x264   :  { %v351_v59 = vmul.f32 0.0078125, %v340_v58  ;;  %v362_v60 = vmul.f32 %v356_v57, %v356_v57 }
 0x266   :  { %v357_v61 = vsub.f32 %v314_v39, %v351_v59  ;;  %368 = vadd.xlane.f32.xlu0 %v362_v60 }
 0x267   :  { %v342_v62 = vpop.xlane.xlu1 %341 }
 0x268   :  { %v352_v2 = vmul.f32 0.0078125, %v342_v62  ;;  %v363_v3 = vmul.f32 %v357_v61, %v357_v61 }
 0x26a   :  { %v358_v4 = vsub.f32 %v319_v43, %v352_v2  ;;  %370 = vadd.xlane.f32.xlu1 %v363_v3 }
 0x26b   :  { %v344_v63 = vpop.xlane.xlu1 %343 }
 0x26c   :  { %v353_v5 = vmul.f32 0.0078125, %v344_v63  ;;  %v364_v6 = vmul.f32 %v358_v4, %v358_v4 }
 0x26e   :  { %v359_v7 = vsub.f32 %v324_v47, %v353_v5  ;;  %372 = vadd.xlane.f32.xlu0 %v364_v6 }
 0x26f   :  { %v346_v1 = vpop.xlane.xlu0 %345 }
 0x270   :  { %v354_v8 = vmul.f32 0.0078125, %v346_v1  ;;  %v365_v9 = vmul.f32 %v359_v7, %v359_v7 }
 0x272   :  { %v360_v10 = vsub.f32 %v329_v51, %v354_v8  ;;  %374 = vadd.xlane.f32.xlu1 %v365_v9 }
 0x273   :  { %v348_v0 = vpop.xlane.xlu1 %347 }
 0x274   :  { %v355_v11 = vmul.f32 0.0078125, %v348_v0  ;;  %v366_v12 = vmul.f32 %v360_v10, %v360_v10 }
 0x276   :  { %v361_v13 = vsub.f32 %v334_v54, %v355_v11  ;;  %376 = vadd.xlane.f32.xlu0 %v366_v12 }
 0x278   :  { %v367_v14 = vmul.f32 %v361_v13, %v361_v13 }
 0x27a   :  { %378 = vadd.xlane.f32.xlu1 %v367_v14 }
 0x2ef   :  { %v369_v15 = vpop.xlane.xlu0 %368 }
 0x2f0   :  { %v380_v16 = vmul.f32 0.0078125, %v369_v15 }
 0x2f2   :  { %v386_v17 = vadd.f32 1e-05, %v380_v16 }
 0x2f3   :  { %v371_v18 = vpop.xlane.xlu1 %370 }
 0x2f4   :  { %511 = vrsqrt.f32 %v386_v17  ;;  %v381_v19 = vmul.f32 0.0078125, %v371_v18 }
 0x2f6   :  { %v387_v20 = vadd.f32 1e-05, %v381_v19 }
 0x2f7   :  { %v373_v21 = vpop.xlane.xlu0 %372 }
 0x2f8   :  { %513 = vrsqrt.f32 %v387_v20  ;;  %v382_v22 = vmul.f32 0.0078125, %v373_v21 }
 0x2fa   :  { %v388_v23 = vadd.f32 1e-05, %v382_v22 }
 0x2fb   :  { %v375_v24 = vpop.xlane.xlu1 %374 }
 0x2fc   :  { %515 = vrsqrt.f32 %v388_v23  ;;  %v383_v25 = vmul.f32 0.0078125, %v375_v24 }
 0x2fe   :  { %v389_v26 = vadd.f32 1e-05, %v383_v25 }
 0x2ff   :  { %v377_v27 = vpop.xlane.xlu0 %376 }
 0x300   :  { %517 = vrsqrt.f32 %v389_v26  ;;  %v384_v28 = vmul.f32 0.0078125, %v377_v27 }
 0x301   :  { %v512_v29 = vpop.eup %511 }
 0x302   :  { %v398_v31 = vmul.f32 %v512_v29, %v356_v57  ;;  %v390_v32 = vadd.f32 1e-05, %v384_v28 }
 0x303   :  { %v379_v33 = vpop.xlane.xlu1 %378 }
 0x304   :  { %v410_v35 = vmul.f32 %v450_v30, %v398_v31  ;;  %519 = vrsqrt.f32 %v390_v32  ;;  %v385_v36 = vmul.f32 0.0078125, %v379_v33 }
 0x305   :  { %v514_v37 = vpop.eup %513 }
 0x306   :  { %v399_v38 = vmul.f32 %v514_v37, %v357_v61  ;;  %v391_v39 = vadd.f32 1e-05, %v385_v36  ;;  %v420_v40 = vadd.f32 %v451_v34, %v410_v35 }
 0x308   :  { %v411_v41 = vmul.f32 %v450_v30, %v399_v38  ;;  %521 = vrsqrt.f32 %v391_v39  ;;  %426 = vst [vmem:[#allocation8] sm:$0xff] %v420_v40 }
 0x309   :  { %v516_v42 = vpop.eup %515 }
 0x30a   :  { %v400_v43 = vmul.f32 %v516_v42, %v358_v4  ;;  %v421_v44 = vadd.f32 %v451_v34, %v411_v41 }
 0x30c   :  { %v412_v45 = vmul.f32 %v450_v30, %v400_v43  ;;  %427 = vst [vmem:[#allocation8 + $0x8] sm:$0xff] %v421_v44 }
 0x30d   :  { %v518_v46 = vpop.eup %517 }
 0x30e   :  { %v401_v47 = vmul.f32 %v518_v46, %v359_v7  ;;  %v422_v48 = vadd.f32 %v451_v34, %v412_v45 }
 0x310   :  { %v413_v49 = vmul.f32 %v450_v30, %v401_v47  ;;  %428 = vst [vmem:[#allocation8 + $0x10] sm:$0xff] %v422_v48 }
 0x311   :  { %v520_v50 = vpop.eup %519 }
 0x312   :  { %v402_v51 = vmul.f32 %v520_v50, %v360_v10  ;;  %v423_v52 = vadd.f32 %v451_v34, %v413_v49 }
 0x314   :  { %v414_v53 = vmul.f32 %v450_v30, %v402_v51  ;;  %429 = vst [vmem:[#allocation8 + $0x18] sm:$0xff] %v423_v52 }
 0x315   :  { %v522_v54 = vpop.eup %521 }
 0x316   :  { %v403_v55 = vmul.f32 %v522_v54, %v361_v13  ;;  %v424_v56 = vadd.f32 %v451_v34, %v414_v53 }
 0x318   :  { %v415_v57 = vmul.f32 %v450_v30, %v403_v55  ;;  %430 = vst [vmem:[#allocation8 + $0x20] sm:$0xff] %v424_v56 }
 0x31a   :  { %v425_v58 = vadd.f32 %v451_v34, %v415_v57 }
 0x31c   :  { %431 = vst [vmem:[#allocation8 + $0x28] sm:$0xff] %v425_v58 }
 0x31d   :  { %594 = shalt.err (!%p591_p5)
}
 0x31e   :  { %443 = dma.vmem_to_hbm [thread:$0]  %s438_s9, 768, %s704_s4, [#allocation4], %s613_s25, %s613_s25, %s614_s26  }
 0x31f   :  { %607 = dma.done.wait [#allocation4], 768  }
 0x320   :  { %608 = vsyncadd [#allocation4], 4294966528 }
 0x321   :  { %447 = vsyncpa [#allocation3], 1 }
 0x322   :  { %448 = vsyncpa [#allocation6], 1 }
 0x323   :  { %449 = vsyncpa [#allocation4], 1 }

// kernel: tpu_custom_call.1
= control target key start
LH: loop header
LB: loop body
LE: loop exit
PB: predicated region body
PF: predicated region fallthrough
CT: control target
= control target key end

     0   :  { %9 = vsyncpa [#allocation3], 0  ;;  %s700_s0 = inlined_call_operand.hbm [shape: f32[48,128], index: 0, kind: input, shape index: {}]   ;;  %s701_s1 = inlined_call_operand.hbm [shape: f32[128,256], index: 1, kind: input, shape index: {}]   ;;  %s702_s2 = inlined_call_operand.hbm [shape: f32[256,128], index: 2, kind: input, shape index: {}]   ;;  %s703_s3 = inlined_call_operand.vmem [shape: f32[2,128], index: 3, kind: input, shape index: {}]   ;;  %s704_s4 = inlined_call_operand.hbm [shape: f32[48,128], index: 4, kind: output, shape index: {}]  }
   0x1   :  { %10 = vsyncpa [#allocation6], 0 }
   0x2   :  { %11 = vsyncpa [#allocation4], 0  ;;  %s609_s15 = smov [#allocation5]  }
   0x3   :  { %s29_s16 = sshll.u32 %s609_s15, 4  ;;  %s30_s16 = int_to_ptr.vmem [resolvable:$true] %s29_s16 }
   0x4   :  { %s531_s17 = scalar_lea.vmem %s30_s16, 4096  ;;  %p536_p1 = scmp.lt.s32.totalorder %s30_s16, %s30_s16 }
   0x5   :  { %p532_p0 = scmp.ne.s32.totalorder %s30_s16, %s531_s17  ;;  %p537_p2 = scmp.lt.s32.totalorder %s531_s17, %s531_s17 }
   0x7   :  { %p538_p3 = por %p537_p2, %p536_p1 }
   0x9   :  { %p539_p4 = pnand %p538_p3, %p532_p0 }
   0xb   :  { %542 = shalt.err (!%p539_p4)
}
   0xc   :  { %s610_s18 = smov 256   ;;  %s611_s19 = smov 16  }
   0xd   :  { %35 = dma.hbm_to_vmem [thread:$0]  %s701_s1, 4096, %s30_s16, [#allocation6], %s610_s18, %s610_s18, %s611_s19  }
   0xe   :  { %s612_s22 = smov [#allocation2]  }
   0xf   :  { %s17_s23 = sshll.u32 %s612_s22, 4  ;;  %s18_s23 = int_to_ptr.vmem [resolvable:$true] %s17_s23 }
  0x10   :  { %s551_s24 = scalar_lea.vmem %s18_s23, 768  ;;  %p556_p6 = scmp.lt.s32.totalorder %s18_s23, %s18_s23 }
  0x11   :  { %p552_p5 = scmp.ne.s32.totalorder %s18_s23, %s551_s24  ;;  %p557_p7 = scmp.lt.s32.totalorder %s551_s24, %s551_s24 }
  0x13   :  { %p558_p8 = por %p557_p7, %p556_p6 }
  0x15   :  { %p559_p9 = pnand %p558_p8, %p552_p5 }
  0x17   :  { %562 = shalt.err (!%p559_p9)
}
  0x18   :  { %s613_s25 = smov 128   ;;  %s614_s26 = smov 8  }
  0x19   :  { %23 = dma.hbm_to_vmem [thread:$0]  %s700_s0, 768, %s18_s23, [#allocation3], %s613_s25, %s613_s25, %s614_s26  }
  0x1a   :  { %s615_s1 = smov [#allocation7]  }
  0x1b   :  { %s41_s29 = sshll.u32 %s615_s1, 4  ;;  %s42_s29 = int_to_ptr.vmem [resolvable:$true] %s41_s29 }
  0x1c   :  { %s571_s30 = scalar_lea.vmem %s42_s29, 4096  ;;  %p576_p11 = scmp.lt.s32.totalorder %s42_s29, %s42_s29 }
  0x1d   :  { %p572_p10 = scmp.ne.s32.totalorder %s42_s29, %s571_s30  ;;  %p577_p12 = scmp.lt.s32.totalorder %s571_s30, %s571_s30 }
  0x1f   :  { %p578_p13 = por %p577_p12, %p576_p11 }
  0x21   :  { %p579_p0 = pnand %p578_p13, %p572_p10 }
  0x23   :  { %582 = shalt.err (!%p579_p0)
}
  0x24   :  { %47 = dma.hbm_to_vmem [thread:$0]  %s702_s2, 4096, %s42_s29, [#allocation6], %s613_s25, %s613_s25, %s614_s26  }
  0x25   :  { %603 = dma.done.wait [#allocation3], 768  }
  0x26   :  { %604 = vsyncadd [#allocation3], 4294966528 }
  0x27   :  { %605 = dma.done.wait [#allocation6], 8192  }
  0x28   :  { %606 = vsyncadd [#allocation6], 4294959104  ;;  %v616_v0 = vmov 0.0   ;;  %v96_v1 = vld [vmem:[#allocation5 + $0xf8] sm:$0xff]  ;;  %v95_v2 = vld [vmem:[#allocation5 + $0xf0] sm:$0xff] }
  0x29   :  { %161 = vmatprep.mubr.f32.mxu0 %v616_v0  ;;  %v94_v3 = vld [vmem:[#allocation5 + $0xe8] sm:$0xff]  ;;  %97 = vmatprep.subr.mxu0 %v96_v1  ;;  %v93_v4 = vld [vmem:[#allocation5 + $0xe0] sm:$0xff]  ;;  %v92_v5 = vld [vmem:[#allocation5 + $0xd8] sm:$0xff] }
  0x2a   :  { %98 = vmatpush1.msra.mxu0 %v95_v2  ;;  %v91_v6 = vld [vmem:[#allocation5 + $0xd0] sm:$0xff]  ;;  %v90_v7 = vld [vmem:[#allocation5 + $0xc8] sm:$0xff]  ;;  %v89_v8 = vld [vmem:[#allocation5 + $0xc0] sm:$0xff] }
  0x2b   :  { %99 = vmatprep.subr.mxu0 %v94_v3  ;;  %v88_v9 = vld [vmem:[#allocation5 + $0xb8] sm:$0xff]  ;;  %v87_v10 = vld [vmem:[#allocation5 + $0xb0] sm:$0xff]  ;;  %v86_v11 = vld [vmem:[#allocation5 + $0xa8] sm:$0xff] }
  0x2c   :  { %100 = vmatpush1.msra.mxu0 %v93_v4  ;;  %v85_v12 = vld [vmem:[#allocation5 + $0xa0] sm:$0xff]  ;;  %v84_v13 = vld [vmem:[#allocation5 + $0x98] sm:$0xff]  ;;  %v83_v14 = vld [vmem:[#allocation5 + $0x90] sm:$0xff] }
  0x2d   :  { %101 = vmatprep.subr.mxu0 %v92_v5  ;;  %v82_v15 = vld [vmem:[#allocation5 + $0x88] sm:$0xff]  ;;  %v81_v16 = vld [vmem:[#allocation5 + $0x80] sm:$0xff]  ;;  %v241_v17 = vld [vmem:[#allocation7 + $0xf8] sm:$0xff] }
  0x2e   :  { %102 = vmatpush1.msra.mxu0 %v91_v6  ;;  %452 = vmatprep.subr.mxu1 %v241_v17  ;;  %v225_v18 = vld [vmem:[#allocation7 + $0x78] sm:$0xff]  ;;  %v240_v19 = vld [vmem:[#allocation7 + $0xf0] sm:$0xff]  ;;  %v239_v22 = vld [vmem:[#allocation7 + $0xe8] sm:$0xff] }
  0x2f   :  { %103 = vmatprep.subr.mxu0 %v90_v7  ;;  %v224_v20 = vld [vmem:[#allocation7 + $0x70] sm:$0xff]  ;;  %v80_v21 = vld [vmem:[#allocation5 + $0x78] sm:$0xff]  ;;  %453 = vmatpush3.msra.mxu1 %v225_v18  ;;  %v223_v24 = vld [vmem:[#allocation7 + $0x68] sm:$0xff] }
  0x30   :  { %104 = vmatpush1.msra.mxu0 %v89_v8  ;;  %v79_v23 = vld [vmem:[#allocation5 + $0x70] sm:$0xff]  ;;  %454 = vmatprep.subr.mxu1 %v240_v19  ;;  %v78_v25 = vld [vmem:[#allocation5 + $0x68] sm:$0xff]  ;;  %v238_v26 = vld [vmem:[#allocation7 + $0xe0] sm:$0xff] }
  0x31   :  { %105 = vmatprep.subr.mxu0 %v88_v9  ;;  %455 = vmatpush3.msra.mxu1 %v224_v20  ;;  %v77_v27 = vld [vmem:[#allocation5 + $0x60] sm:$0xff]  ;;  %v76_v29 = vld [vmem:[#allocation5 + $0x58] sm:$0xff]  ;;  %v75_v31 = vld [vmem:[#allocation5 + $0x50] sm:$0xff] }
  0x32   :  { %106 = vmatpush1.msra.mxu0 %v87_v10  ;;  %456 = vmatprep.subr.mxu1 %v239_v22  ;;  %v222_v28 = vld [vmem:[#allocation7 + $0x60] sm:$0xff]  ;;  %v237_v30 = vld [vmem:[#allocation7 + $0xd8] sm:$0xff]  ;;  %v74_v33 = vld [vmem:[#allocation5 + $0x48] sm:$0xff] }
  0x33   :  { %107 = vmatprep.subr.mxu0 %v86_v11  ;;  %457 = vmatpush3.msra.mxu1 %v223_v24  ;;  %v221_v32 = vld [vmem:[#allocation7 + $0x58] sm:$0xff]  ;;  %v236_v34 = vld [vmem:[#allocation7 + $0xd0] sm:$0xff]  ;;  %v73_v35 = vld [vmem:[#allocation5 + $0x40] sm:$0xff] }
  0x34   :  { %108 = vmatpush1.msra.mxu0 %v85_v12  ;;  %458 = vmatprep.subr.mxu1 %v238_v26  ;;  %v220_v36 = vld [vmem:[#allocation7 + $0x50] sm:$0xff]  ;;  %v72_v37 = vld [vmem:[#allocation5 + $0x38] sm:$0xff]  ;;  %v235_v38 = vld [vmem:[#allocation7 + $0xc8] sm:$0xff] }
  0x35   :  { %109 = vmatprep.subr.mxu0 %v84_v13  ;;  %459 = vmatpush3.msra.mxu1 %v222_v28  ;;  %v71_v39 = vld [vmem:[#allocation5 + $0x30] sm:$0xff]  ;;  %v219_v40 = vld [vmem:[#allocation7 + $0x48] sm:$0xff]  ;;  %v234_v42 = vld [vmem:[#allocation7 + $0xc0] sm:$0xff] }
  0x36   :  { %110 = vmatpush1.msra.mxu0 %v83_v14  ;;  %460 = vmatprep.subr.mxu1 %v237_v30  ;;  %v70_v41 = vld [vmem:[#allocation5 + $0x28] sm:$0xff]  ;;  %v69_v43 = vld [vmem:[#allocation5 + $0x20] sm:$0xff]  ;;  %v68_v45 = vld [vmem:[#allocation5 + $0x18] sm:$0xff] }
  0x37   :  { %111 = vmatprep.subr.mxu0 %v82_v15  ;;  %461 = vmatpush3.msra.mxu1 %v221_v32  ;;  %v218_v44 = vld [vmem:[#allocation7 + $0x40] sm:$0xff]  ;;  %v233_v46 = vld [vmem:[#allocation7 + $0xb8] sm:$0xff]  ;;  %v67_v47 = vld [vmem:[#allocation5 + $0x10] sm:$0xff] }
  0x38   :  { %112 = vmatpush1.msra.mxu0 %v81_v16  ;;  %462 = vmatprep.subr.mxu1 %v236_v34  ;;  %v217_v48 = vld [vmem:[#allocation7 + $0x38] sm:$0xff]  ;;  %v66_v49 = vld [vmem:[#allocation5 + $0x8] sm:$0xff]  ;;  %v232_v50 = vld [vmem:[#allocation7 + $0xb0] sm:$0xff] }
  0x39   :  { %113 = vmatprep.subr.mxu0 %v80_v21  ;;  %463 = vmatpush3.msra.mxu1 %v220_v36  ;;  %v65_v51 = vld [vmem:[#allocation5] sm:$0xff]  ;;  %v216_v52 = vld [vmem:[#allocation7 + $0x30] sm:$0xff]  ;;  %v231_v54 = vld [vmem:[#allocation7 + $0xa8] sm:$0xff] }
  0x3a   :  { %114 = vmatpush1.msra.mxu0 %v79_v23  ;;  %464 = vmatprep.subr.mxu1 %v235_v38  ;;  %v659_v53 = vld [vmem:[#allocation2] sm:$0xff]  ;;  %v215_v55 = vld [vmem:[#allocation7 + $0x28] sm:$0xff]  ;;  %v230_v56 = vld [vmem:[#allocation7 + $0xa0] sm:$0xff] }
  0x3b   :  { %115 = vmatprep.subr.mxu0 %v78_v25  ;;  %465 = vmatpush3.msra.mxu1 %v219_v40  ;;  %v214_v57 = vld [vmem:[#allocation7 + $0x20] sm:$0xff]  ;;  %v663_v58 = vld [vmem:[#allocation2 + $0x8] sm:$0xff]  ;;  %v671_v62 = vld [vmem:[#allocation2 + $0x18] sm:$0xff] }
  0x3c   :  { %116 = vmatpush1.msra.mxu0 %v77_v27  ;;  %466 = vmatprep.subr.mxu1 %v234_v42  ;;  %v229_v59 = vld [vmem:[#allocation7 + $0x98] sm:$0xff]  ;;  %v667_v61 = vld [vmem:[#allocation2 + $0x10] sm:$0xff]  ;;  %v675_v63 = vld [vmem:[#allocation2 + $0x20] sm:$0xff] }
  0x3d   :  { %117 = vmatprep.subr.mxu0 %v76_v29  ;;  %467 = vmatpush3.msra.mxu1 %v218_v44  ;;  %v213_v60 = vld [vmem:[#allocation7 + $0x18] sm:$0xff]  ;;  %v228_v2 = vld [vmem:[#allocation7 + $0x90] sm:$0xff]  ;;  %v227_v4 = vld [vmem:[#allocation7 + $0x88] sm:$0xff] }
  0x3e   :  { %118 = vmatpush1.msra.mxu0 %v75_v31  ;;  %468 = vmatprep.subr.mxu1 %v233_v46  ;;  %v679_v1 = vld [vmem:[#allocation2 + $0x28] sm:$0xff]  ;;  %v212_v3 = vld [vmem:[#allocation7 + $0x10] sm:$0xff]  ;;  %v211_v5 = vld [vmem:[#allocation7 + $0x8] sm:$0xff] }
  0x3f   :  { %119 = vmatprep.subr.mxu0 %v74_v33  ;;  %469 = vmatpush3.msra.mxu1 %v217_v48  ;;  %v226_v6 = vld [vmem:[#allocation7 + $0x80] sm:$0xff] }
  0x40   :  { %120 = vmatpush1.msra.mxu0 %v73_v35  ;;  %470 = vmatprep.subr.mxu1 %v232_v50  ;;  %v210_v7 = vld [vmem:[#allocation7] sm:$0xff] }
  0x41   :  { %121 = vmatprep.subr.mxu0 %v72_v37  ;;  %471 = vmatpush3.msra.mxu1 %v216_v52 }
  0x42   :  { %122 = vmatpush1.msra.mxu0 %v71_v39  ;;  %472 = vmatprep.subr.mxu1 %v231_v54 }
  0x43   :  { %123 = vmatprep.subr.mxu0 %v70_v41  ;;  %473 = vmatpush3.msra.mxu1 %v215_v55 }
  0x44   :  { %124 = vmatpush1.msra.mxu0 %v69_v43  ;;  %474 = vmatprep.subr.mxu1 %v230_v56 }
  0x45   :  { %125 = vmatprep.subr.mxu0 %v68_v45  ;;  %475 = vmatpush3.msra.mxu1 %v214_v57 }
  0x46   :  { %126 = vmatpush1.msra.mxu0 %v67_v47  ;;  %476 = vmatprep.subr.mxu1 %v229_v59 }
  0x47   :  { %127 = vmatprep.subr.mxu0 %v66_v49  ;;  %477 = vmatpush3.msra.mxu1 %v213_v60 }
  0x48   :  { %128 = vmatpush1.msra.mxu0 %v65_v51  ;;  %478 = vmatprep.subr.mxu1 %v228_v2 }
  0x49   :  { %162 = vmatmul.mubr.f32.vlgmr.msra.gmra.mxu0 %v659_v53  ;;  %479 = vmatpush3.msra.mxu1 %v212_v3 }
  0x4a   :  { %167 = vmatprep.mubr.f32.mxu0 %v616_v0  ;;  %480 = vmatprep.subr.mxu1 %v227_v4 }
  0x4b   :  { %481 = vmatpush3.msra.mxu1 %v211_v5 }
  0x4c   :  { %482 = vmatprep.subr.mxu1 %v226_v6 }
  0x4d   :  { %168 = vmatmul.mubr.f32.gmra.mxu0 %v663_v58  ;;  %483 = vmatpush3.msra.mxu1 %v210_v7 }
  0x4e   :  { %173 = vmatprep.mubr.f32.mxu0 %v616_v0 }
  0x51   :  { %174 = vmatmul.mubr.f32.gmra.mxu0 %v667_v61 }
  0x52   :  { %179 = vmatprep.mubr.f32.mxu0 %v616_v0 }
  0x55   :  { %180 = vmatmul.mubr.f32.gmra.mxu0 %v671_v62 }
  0x56   :  { %185 = vmatprep.mubr.f32.mxu0 %v616_v0 }
  0x59   :  { %186 = vmatmul.mubr.f32.gmra.mxu0 %v675_v63 }
  0x5a   :  { %191 = vmatprep.mubr.f32.mxu0 %v616_v0 }
  0x5d   :  { %192 = vmatmul.mubr.f32.gmra.mxu0 %v679_v1 }
 0x109   :  { %v163_v8 = vpop.f32.mrf.mxu0 }
 0x10a   :  { %v198_v0 = vmax.f32 %v163_v8, 0.0 }
 0x10b   :  { %v165_v9 = vpop.f32.mrf.mxu0 }
 0x10c   :  { %v199_v10 = vmax.f32 %v165_v9, 0.0 }
 0x10d   :  { %v169_v11 = vpop.f32.mrf.mxu0 }
 0x10e   :  { %306 = vmatprep.mubr.f32.mxu1 %v199_v10  ;;  %v200_v14 = vmax.f32 %v169_v11, 0.0 }
 0x10f   :  { %v171_v12 = vpop.f32.mrf.mxu0  ;;  %307 = vmatmul.mubr.f32.vlgmr.msra.gmra.mxu1 %v198_v0 }
 0x110   :  { %v201_v13 = vmax.f32 %v171_v12, 0.0 }
 0x111   :  { %v175_v15 = vpop.f32.mrf.mxu0 }
 0x112   :  { %311 = vmatprep.mubr.f32.mxu1 %v201_v13  ;;  %v202_v18 = vmax.f32 %v175_v15, 0.0 }
 0x113   :  { %v177_v16 = vpop.f32.mrf.mxu0  ;;  %312 = vmatmul.mubr.f32.gmra.mxu1 %v200_v14 }
 0x114   :  { %v203_v17 = vmax.f32 %v177_v16, 0.0 }
 0x115   :  { %v181_v19 = vpop.f32.mrf.mxu0 }
 0x116   :  { %316 = vmatprep.mubr.f32.mxu1 %v203_v17  ;;  %v204_v22 = vmax.f32 %v181_v19, 0.0 }
 0x117   :  { %v183_v20 = vpop.f32.mrf.mxu0  ;;  %317 = vmatmul.mubr.f32.gmra.mxu1 %v202_v18 }
 0x118   :  { %v205_v21 = vmax.f32 %v183_v20, 0.0 }
 0x119   :  { %v187_v23 = vpop.f32.mrf.mxu0 }
 0x11a   :  { %321 = vmatprep.mubr.f32.mxu1 %v205_v21  ;;  %v206_v26 = vmax.f32 %v187_v23, 0.0 }
 0x11b   :  { %v189_v24 = vpop.f32.mrf.mxu0  ;;  %322 = vmatmul.mubr.f32.gmra.mxu1 %v204_v22 }
 0x11c   :  { %v207_v25 = vmax.f32 %v189_v24, 0.0 }
 0x11d   :  { %v193_v27 = vpop.f32.mrf.mxu0 }
 0x11e   :  { %326 = vmatprep.mubr.f32.mxu1 %v207_v25  ;;  %v208_v30 = vmax.f32 %v193_v27, 0.0 }
 0x11f   :  { %v195_v28 = vpop.f32.mrf.mxu0  ;;  %327 = vmatmul.mubr.f32.gmra.mxu1 %v206_v26 }
 0x120   :  { %v209_v29 = vmax.f32 %v195_v28, 0.0 }
 0x122   :  { %331 = vmatprep.mubr.f32.mxu1 %v209_v29 }
 0x123   :  { %332 = vmatmul.mubr.f32.gmra.mxu1 %v208_v30  ;;  %v450_v30 = vld [vmem:[%s703_s3] ss:$0 sm:$0xff] }
 0x1cf   :  { %v484_v31 = vpop.f32.mrf.mxu1 }
 0x1d1   :  { %v485_v32 = vpop.f32.mrf.mxu1 }
 0x1d2   :  { %v486_v33 = vadd.f32 %v485_v32, %v484_v31 }
 0x1d3   :  { %v487_v34 = vpop.f32.mrf.mxu1 }
 0x1d4   :  { %v309_v35 = vadd.f32 %v486_v33, %v659_v53 }
 0x1d5   :  { %v488_v36 = vpop.f32.mrf.mxu1 }
 0x1d6   :  { %v489_v37 = vadd.f32 %v488_v36, %v487_v34  ;;  %337 = vadd.xlane.f32.xlu0 %v309_v35  ;;  %v451_v34 = vld [vmem:[%s703_s3 + $0x1] ss:$0 sm:$0xff]  ;;  %s617_s3 = smov [#allocation8]  }
 0x1d7   :  { %v490_v38 = vpop.f32.mrf.mxu1  ;;  %s437_s9 = sshll.u32 %s617_s3, 4  ;;  %s438_s9 = int_to_ptr.vmem [resolvable:$true] %s437_s9 }
 0x1d8   :  { %v314_v39 = vadd.f32 %v489_v37, %v663_v58  ;;  %s583_s10 = scalar_lea.vmem %s438_s9, 768  ;;  %p588_p2 = scmp.lt.s32.totalorder %s438_s9, %s438_s9 }
 0x1d9   :  { %v491_v40 = vpop.f32.mrf.mxu1  ;;  %p584_p1 = scmp.ne.s32.totalorder %s438_s9, %s583_s10  ;;  %p589_p3 = scmp.lt.s32.totalorder %s583_s10, %s583_s10 }
 0x1da   :  { %v492_v41 = vadd.f32 %v491_v40, %v490_v38  ;;  %339 = vadd.xlane.f32.xlu0 %v314_v39 }
 0x1db   :  { %v493_v42 = vpop.f32.mrf.mxu1  ;;  %p590_p4 = por %p589_p3, %p588_p2 }
 0x1dc   :  { %v319_v43 = vadd.f32 %v492_v41, %v667_v61 }
 0x1dd   :  { %v494_v44 = vpop.f32.mrf.mxu1  ;;  %p591_p5 = pnand %p590_p4, %p584_p1 }
 0x1de   :  { %v495_v45 = vadd.f32 %v494_v44, %v493_v42  ;;  %341 = vadd.xlane.f32.xlu1 %v319_v43 }
 0x1df   :  { %v496_v46 = vpop.f32.mrf.mxu1 }
 0x1e0   :  { %v324_v47 = vadd.f32 %v495_v45, %v671_v62 }
 0x1e1   :  { %v497_v48 = vpop.f32.mrf.mxu1 }
 0x1e2   :  { %v498_v49 = vadd.f32 %v497_v48, %v496_v46  ;;  %343 = vadd.xlane.f32.xlu1 %v324_v47 }
 0x1e3   :  { %v499_v50 = vpop.f32.mrf.mxu1 }
 0x1e4   :  { %v329_v51 = vadd.f32 %v498_v49, %v675_v63 }
 0x1e5   :  { %v500_v52 = vpop.f32.mrf.mxu1 }
 0x1e6   :  { %v501_v53 = vadd.f32 %v500_v52, %v499_v50  ;;  %345 = vadd.xlane.f32.xlu0 %v329_v51 }
 0x1e8   :  { %v334_v54 = vadd.f32 %v501_v53, %v679_v1 }
 0x1ea   :  { %347 = vadd.xlane.f32.xlu1 %v334_v54 }
 0x25f   :  { %v338_v55 = vpop.xlane.xlu0 %337 }
 0x260   :  { %v350_v56 = vmul.f32 0.0078125, %v338_v55 }
 0x262   :  { %v356_v57 = vsub.f32 %v309_v35, %v350_v56 }
 0x263   :  { %v340_v58 = vpop.xlane.xlu0 %339 }
 0x264   :  { %v351_v59 = vmul.f32 0.0078125, %v340_v58  ;;  %v362_v60 = vmul.f32 %v356_v57, %v356_v57 }
 0x266   :  { %v357_v61 = vsub.f32 %v314_v39, %v351_v59  ;;  %368 = vadd.xlane.f32.xlu0 %v362_v60 }
 0x267   :  { %v342_v62 = vpop.xlane.xlu1 %341 }
 0x268   :  { %v352_v2 = vmul.f32 0.0078125, %v342_v62  ;;  %v363_v3 = vmul.f32 %v357_v61, %v357_v61 }
 0x26a   :  { %v358_v4 = vsub.f32 %v319_v43, %v352_v2  ;;  %370 = vadd.xlane.f32.xlu1 %v363_v3 }
 0x26b   :  { %v344_v63 = vpop.xlane.xlu1 %343 }
 0x26c   :  { %v353_v5 = vmul.f32 0.0078125, %v344_v63  ;;  %v364_v6 = vmul.f32 %v358_v4, %v358_v4 }
 0x26e   :  { %v359_v7 = vsub.f32 %v324_v47, %v353_v5  ;;  %372 = vadd.xlane.f32.xlu0 %v364_v6 }
 0x26f   :  { %v346_v1 = vpop.xlane.xlu0 %345 }
 0x270   :  { %v354_v8 = vmul.f32 0.0078125, %v346_v1  ;;  %v365_v9 = vmul.f32 %v359_v7, %v359_v7 }
 0x272   :  { %v360_v10 = vsub.f32 %v329_v51, %v354_v8  ;;  %374 = vadd.xlane.f32.xlu1 %v365_v9 }
 0x273   :  { %v348_v0 = vpop.xlane.xlu1 %347 }
 0x274   :  { %v355_v11 = vmul.f32 0.0078125, %v348_v0  ;;  %v366_v12 = vmul.f32 %v360_v10, %v360_v10 }
 0x276   :  { %v361_v13 = vsub.f32 %v334_v54, %v355_v11  ;;  %376 = vadd.xlane.f32.xlu0 %v366_v12 }
 0x278   :  { %v367_v14 = vmul.f32 %v361_v13, %v361_v13 }
 0x27a   :  { %378 = vadd.xlane.f32.xlu1 %v367_v14 }
 0x2ef   :  { %v369_v15 = vpop.xlane.xlu0 %368 }
 0x2f0   :  { %v380_v16 = vmul.f32 0.0078125, %v369_v15 }
 0x2f2   :  { %v386_v17 = vadd.f32 1e-05, %v380_v16 }
 0x2f3   :  { %v371_v18 = vpop.xlane.xlu1 %370 }
 0x2f4   :  { %511 = vrsqrt.f32 %v386_v17  ;;  %v381_v19 = vmul.f32 0.0078125, %v371_v18 }
 0x2f6   :  { %v387_v20 = vadd.f32 1e-05, %v381_v19 }
 0x2f7   :  { %v373_v21 = vpop.xlane.xlu0 %372 }
 0x2f8   :  { %513 = vrsqrt.f32 %v387_v20  ;;  %v382_v22 = vmul.f32 0.0078125, %v373_v21 }
 0x2fa   :  { %v388_v23 = vadd.f32 1e-05, %v382_v22 }
 0x2fb   :  { %v375_v24 = vpop.xlane.xlu1 %374 }
 0x2fc   :  { %515 = vrsqrt.f32 %v388_v23  ;;  %v383_v25 = vmul.f32 0.0078125, %v375_v24 }
 0x2fe   :  { %v389_v26 = vadd.f32 1e-05, %v383_v25 }
 0x2ff   :  { %v377_v27 = vpop.xlane.xlu0 %376 }
 0x300   :  { %517 = vrsqrt.f32 %v389_v26  ;;  %v384_v28 = vmul.f32 0.0078125, %v377_v27 }
 0x301   :  { %v512_v29 = vpop.eup %511 }
 0x302   :  { %v398_v31 = vmul.f32 %v512_v29, %v356_v57  ;;  %v390_v32 = vadd.f32 1e-05, %v384_v28 }
 0x303   :  { %v379_v33 = vpop.xlane.xlu1 %378 }
 0x304   :  { %v410_v35 = vmul.f32 %v450_v30, %v398_v31  ;;  %519 = vrsqrt.f32 %v390_v32  ;;  %v385_v36 = vmul.f32 0.0078125, %v379_v33 }
 0x305   :  { %v514_v37 = vpop.eup %513 }
 0x306   :  { %v399_v38 = vmul.f32 %v514_v37, %v357_v61  ;;  %v391_v39 = vadd.f32 1e-05, %v385_v36  ;;  %v420_v40 = vadd.f32 %v451_v34, %v410_v35 }
 0x308   :  { %v411_v41 = vmul.f32 %v450_v30, %v399_v38  ;;  %521 = vrsqrt.f32 %v391_v39  ;;  %426 = vst [vmem:[#allocation8] sm:$0xff] %v420_v40 }
 0x309   :  { %v516_v42 = vpop.eup %515 }
 0x30a   :  { %v400_v43 = vmul.f32 %v516_v42, %v358_v4  ;;  %v421_v44 = vadd.f32 %v451_v34, %v411_v41 }
 0x30c   :  { %v412_v45 = vmul.f32 %v450_v30, %v400_v43  ;;  %427 = vst [vmem:[#allocation8 + $0x8] sm:$0xff] %v421_v44 }
 0x30d   :  { %v518_v46 = vpop.eup %517 }
 0x30e   :  { %v401_v47 = vmul.f32 %v518_v46, %v359_v7  ;;  %v422_v48 = vadd.f32 %v451_v34, %v412_v45 }
 0x310   :  { %v413_v49 = vmul.f32 %v450_v30, %v401_v47  ;;  %428 = vst [vmem:[#allocation8 + $0x10] sm:$0xff] %v422_v48 }
 0x311   :  { %v520_v50 = vpop.eup %519 }
 0x312   :  { %v402_v51 = vmul.f32 %v520_v50, %v360_v10  ;;  %v423_v52 = vadd.f32 %v451_v34, %v413_v49 }
 0x314   :  { %v414_v53 = vmul.f32 %v450_v30, %v402_v51  ;;  %429 = vst [vmem:[#allocation8 + $0x18] sm:$0xff] %v423_v52 }
 0x315   :  { %v522_v54 = vpop.eup %521 }
 0x316   :  { %v403_v55 = vmul.f32 %v522_v54, %v361_v13  ;;  %v424_v56 = vadd.f32 %v451_v34, %v414_v53 }
 0x318   :  { %v415_v57 = vmul.f32 %v450_v30, %v403_v55  ;;  %430 = vst [vmem:[#allocation8 + $0x20] sm:$0xff] %v424_v56 }
 0x31a   :  { %v425_v58 = vadd.f32 %v451_v34, %v415_v57 }
 0x31c   :  { %431 = vst [vmem:[#allocation8 + $0x28] sm:$0xff] %v425_v58 }
 0x31d   :  { %594 = shalt.err (!%p591_p5)
}
 0x31e   :  { %443 = dma.vmem_to_hbm [thread:$0]  %s438_s9, 768, %s704_s4, [#allocation4], %s613_s25, %s613_s25, %s614_s26  }
 0x31f   :  { %607 = dma.done.wait [#allocation4], 768  }
 0x320   :  { %608 = vsyncadd [#allocation4], 4294966528 }
 0x321   :  { %447 = vsyncpa [#allocation3], 1 }
 0x322   :  { %448 = vsyncpa [#allocation6], 1 }
 0x323   :  { %449 = vsyncpa [#allocation4], 1 }

</bundles_post_ra>
